<compile_context>
chip_gen: v7x
topology: tpu7x:2x2x1
jax: 0.10.0
libtpu: 0.0.40
codegen_flags: <defaults>
</compile_context>

<pallas_src>
import functools

import jax
import jax.numpy as jnp
from jax.experimental import pallas as pl
from jax.experimental.pallas import tpu as pltpu

DROP_P = 0.9


def _attn_dropout_kernel(q_ref, k_ref, v_ref, bits_ref, o_ref, *,
                         scale, threshold, keep_scale):
    # One group of G (batch*head) slices per grid step.
    q = q_ref[...]                                  # (G, M, D)
    k = k_ref[...]                                  # (G, N, D)
    v = v_ref[...]                                  # (G, N, E)

    # scores: contraction over D directly on the MXU (no explicit k transpose).
    s = jnp.einsum('gmd,gnd->gmn', q, k,
                   preferred_element_type=jnp.float32)          # (G, M, N)

    # NOTE: faithful to the PyTorch module, which divides by v.size(-1)**-0.5,
    # i.e. multiplies the scores by sqrt(E). Multiply by a compile-time const.
    scaled = s * jnp.float32(scale)

    # numerically stable softmax pieces (normalization folded below).
    m = jnp.max(scaled, axis=-1, keepdims=True)
    e = jnp.exp(scaled - m)
    denom = jnp.sum(e, axis=-1, keepdims=True)                  # (G, M, 1)

    # training-mode dropout with an integer threshold compare on raw uint32
    # bits; fold the softmax denominator and the 1/(1-p) rescale into a single
    # per-row factor so there is no full-tile divide.
    # TODO(synk): dropout mask cannot bit-match torch's RNG stream.
    keep = bits_ref[...] >= jnp.uint32(threshold)               # (G, M, N)
    inv = jnp.float32(keep_scale) / denom                       # (G, M, 1)
    dsm = jnp.where(keep, e * inv, jnp.float32(0.0))

    # output = dropout(softmax(scores)) @ v  (cast probs to v's dtype so bf16
    # inputs hit the MXU's native path; accumulation stays f32).
    out = jnp.einsum('gmn,gne->gme', dsm.astype(v.dtype), v,
                     preferred_element_type=jnp.float32)        # (G, M, E)
    o_ref[...] = out.astype(o_ref.dtype)


def _pick_group(bh, max_g=16):
    """Largest divisor of bh that is <= max_g (heads per grid step)."""
    for g in range(min(bh, max_g), 0, -1):
        if bh % g == 0:
            return g
    return 1


def attn_dropout(q, k, v, *, drop_p=DROP_P, seed=0):
    """q: (B,H,M,D)  k: (B,H,N,D)  v: (B,H,N,E)  ->  (B,H,M,E)"""
    B, H, M, D = q.shape
    _, _, N, _ = k.shape
    E = v.shape[-1]
    BH = B * H

    qf = q.reshape(BH, M, D)
    kf = k.reshape(BH, N, D)
    vf = v.reshape(BH, N, E)

    # Pre-generated dropout randomness (uint32 bits); deterministic in `seed`.
    bits = jax.random.bits(jax.random.PRNGKey(seed), (BH, M, N),
                           dtype=jnp.uint32)

    G = _pick_group(BH)
    grid = (BH // G,)

    scale = float(E) ** 0.5                       # == qk / (v.size(-1) ** -0.5)
    threshold = min(int(round(drop_p * (1 << 32))), (1 << 32) - 1)
    keep_scale = (1.0 / (1.0 - drop_p)) if drop_p < 1.0 else 0.0

    kernel = functools.partial(_attn_dropout_kernel, scale=scale,
                               threshold=threshold, keep_scale=keep_scale)

    itemsize = jnp.dtype(q.dtype).itemsize
    cost = pl.CostEstimate(
        flops=2 * BH * (M * N * D + M * N * E),
        transcendentals=BH * M * N,
        bytes_accessed=(qf.size + kf.size + vf.size + BH * M * E) * itemsize
                       + bits.size * 4,
    )

    # TODO(synk): for long sequences (esp. v7x's 64 MiB VMEM) tile N with an
    # online-softmax accumulator instead of keeping the full score tile.
    out = pl.pallas_call(
        kernel,
        out_shape=jax.ShapeDtypeStruct((BH, M, E), q.dtype),
        grid_spec=pltpu.PrefetchScalarGridSpec(
            num_scalar_prefetch=0,
            grid=grid,
            in_specs=[
                pl.BlockSpec((G, M, D), lambda i: (i, 0, 0)),
                pl.BlockSpec((G, N, D), lambda i: (i, 0, 0)),
                pl.BlockSpec((G, N, E), lambda i: (i, 0, 0)),
                pl.BlockSpec((G, M, N), lambda i: (i, 0, 0)),
            ],
            out_specs=pl.BlockSpec((G, M, E), lambda i: (i, 0, 0)),
        ),
        compiler_params=pltpu.CompilerParams(
            dimension_semantics=("parallel",)),
        cost_estimate=cost,
    )(qf, kf, vf, bits)

    return out.reshape(B, H, M, E)


if __name__ == "__main__":
    key = jax.random.PRNGKey(0)
    kq, kk, kv = jax.random.split(key, 3)

    # Small shapes consistent with the forward pass: q:(B,H,M,D), k:(B,H,N,D),
    # v:(B,H,N,E) with matching D and N. E=128 keeps the output lane-dense.
    B, H, M, D, N, E = 2, 4, 16, 32, 32, 128
    q = jax.random.normal(kq, (B, H, M, D), dtype=jnp.float32)
    k = jax.random.normal(kk, (B, H, N, D), dtype=jnp.float32)
    v = jax.random.normal(kv, (B, H, N, E), dtype=jnp.float32)

    out = attn_dropout(q, k, v, seed=0)
    jax.block_until_ready(out)
    assert out.shape == (B, H, M, E)
    assert bool(jnp.all(jnp.isfinite(out)))
    print("KERNEL_OK")
</pallas_src>

<mosaic_0001>
module attributes {stable_mosaic.version = 11 : i64} {
  func.func @_attn_dropout_kernel(%arg0: i32, %arg1: memref<8x16x32xf32, #tpu.memory_space<vmem>>, %arg2: memref<8x32x32xf32, #tpu.memory_space<vmem>>, %arg3: memref<8x32x128xf32, #tpu.memory_space<vmem>>, %arg4: memref<8x16x32xi32, #tpu.memory_space<vmem>>, %arg5: memref<8x16x128xf32, #tpu.memory_space<vmem>>) attributes {dimension_semantics = [#tpu.dimension_semantics<parallel>], iteration_bounds = array<i64: 1>, scalar_prefetch = 0 : i64, scratch_operands = 0 : i64, tpu.core_type = #tpu.core_type<tc>, window_params = [{transform_indices = @transform_0, window_bounds = array<i64: 8, 16, 32>}, {transform_indices = @transform_1, window_bounds = array<i64: 8, 32, 32>}, {transform_indices = @transform_2, window_bounds = array<i64: 8, 32, 128>}, {transform_indices = @transform_3, window_bounds = array<i64: 8, 16, 32>}, {transform_indices = @transform_4, window_bounds = array<i64: 8, 16, 128>}]} {
    %c0 = arith.constant 0 : index
    %c0_0 = arith.constant 0 : index
    %c0_1 = arith.constant 0 : index
    %0 = vector.load %arg1[%c0, %c0_0, %c0_1] : memref<8x16x32xf32, #tpu.memory_space<vmem>>, vector<8x16x32xf32>
    %c0_2 = arith.constant 0 : index
    %c0_3 = arith.constant 0 : index
    %c0_4 = arith.constant 0 : index
    %1 = vector.load %arg2[%c0_2, %c0_3, %c0_4] : memref<8x32x32xf32, #tpu.memory_space<vmem>>, vector<8x32x32xf32>
    %c0_5 = arith.constant 0 : index
    %c0_6 = arith.constant 0 : index
    %c0_7 = arith.constant 0 : index
    %2 = vector.load %arg3[%c0_5, %c0_6, %c0_7] : memref<8x32x128xf32, #tpu.memory_space<vmem>>, vector<8x32x128xf32>
    "tpu.trace_start"() <{level = 10 : i32, message = "gmd,gnd->gmn"}> : () -> ()
    %cst = arith.constant dense<0.000000e+00> : vector<8x16x32xf32>
    %3 = tpu.matmul %0, %1, %cst {dimension_numbers = #tpu.dot_dimension_numbers<[2], [2], [1], [1], [0, 0, 0, 1, 1, 1], [0], [0]>} : vector<8x16x32xf32>, vector<8x32x32xf32>, vector<8x16x32xf32> -> vector<8x16x32xf32>
    "tpu.trace_stop"() : () -> ()
    %cst_8 = arith.constant 11.3137083 : f32
    %4 = vector.broadcast %cst_8 : f32 to vector<8x16x32xf32>
    %5 = arith.mulf %3, %4 : vector<8x16x32xf32>
    %cst_9 = arith.constant dense<0xFF800000> : vector<8x16xf32>
    %6 = vector.multi_reduction <maximumf>, %5, %cst_9 [2] : vector<8x16x32xf32> to vector<8x16xf32>
    %7 = vector.shape_cast %6 : vector<8x16xf32> to vector<8x16x1xf32>
    %8 = vector.broadcast %7 : vector<8x16x1xf32> to vector<8x16x32xf32>
    %9 = arith.subf %5, %8 : vector<8x16x32xf32>
    %10 = math.exp %9 : vector<8x16x32xf32>
    %cst_10 = arith.constant dense<0.000000e+00> : vector<8x16xf32>
    %11 = vector.multi_reduction <add>, %10, %cst_10 [2] : vector<8x16x32xf32> to vector<8x16xf32>
    %12 = vector.shape_cast %11 : vector<8x16xf32> to vector<8x16x1xf32>
    %c0_11 = arith.constant 0 : index
    %c0_12 = arith.constant 0 : index
    %c0_13 = arith.constant 0 : index
    %13 = vector.load %arg4[%c0_11, %c0_12, %c0_13] : memref<8x16x32xi32, #tpu.memory_space<vmem>>, vector<8x16x32xi32>
    %c-429496730_i32 = arith.constant -429496730 : i32
    %14 = vector.broadcast %c-429496730_i32 : i32 to vector<8x16x32xi32>
    %15 = arith.cmpi uge, %13, %14 : vector<8x16x32xi32>
    %cst_14 = arith.constant 1.000000e+01 : f32
    %16 = vector.broadcast %cst_14 : f32 to vector<8x16x1xf32>
    %17 = arith.divf %16, %12 : vector<8x16x1xf32>
    %18 = vector.broadcast %17 : vector<8x16x1xf32> to vector<8x16x32xf32>
    %19 = arith.mulf %10, %18 : vector<8x16x32xf32>
    %cst_15 = arith.constant 0.000000e+00 : f32
    %20 = vector.broadcast %cst_15 : f32 to vector<8x16x32xf32>
    %21 = arith.select %15, %19, %20 : vector<8x16x32xi1>, vector<8x16x32xf32>
    "tpu.trace_start"() <{level = 10 : i32, message = "gmn,gne->gme"}> : () -> ()
    %cst_16 = arith.constant dense<0.000000e+00> : vector<8x16x128xf32>
    %22 = tpu.matmul %21, %2, %cst_16 {dimension_numbers = #tpu.dot_dimension_numbers<[2], [1], [1], [2], [0, 0, 0, 1, 1, 2], [0], [0]>} : vector<8x16x32xf32>, vector<8x32x128xf32>, vector<8x16x128xf32> -> vector<8x16x128xf32>
    "tpu.trace_stop"() : () -> ()
    %c0_17 = arith.constant 0 : index
    %c0_18 = arith.constant 0 : index
    %c0_19 = arith.constant 0 : index
    %23 = vector.load %arg5[%c0_17, %c0_18, %c0_19] : memref<8x16x128xf32, #tpu.memory_space<vmem>>, vector<8x16x128xf32>
    tpu.vector_store %arg5[%c0_17, %c0_18, %c0_19], %22 {strides = array<i32>} : memref<8x16x128xf32, #tpu.memory_space<vmem>>, vector<8x16x128xf32>,
    return
  }
  func.func @transform_0(%arg0: i32) -> (i32, i32, i32) {
    %c0_i32 = arith.constant 0 : i32
    %c0_i32_0 = arith.constant 0 : i32
    %c0_i32_1 = arith.constant 0 : i32
    return %arg0, %c0_i32, %c0_i32_0 : i32, i32, i32
  }
  func.func @transform_1(%arg0: i32) -> (i32, i32, i32) {
    %c0_i32 = arith.constant 0 : i32
    %c0_i32_0 = arith.constant 0 : i32
    %c0_i32_1 = arith.constant 0 : i32
    return %arg0, %c0_i32, %c0_i32_0 : i32, i32, i32
  }
  func.func @transform_2(%arg0: i32) -> (i32, i32, i32) {
    %c0_i32 = arith.constant 0 : i32
    %c0_i32_0 = arith.constant 0 : i32
    %c0_i32_1 = arith.constant 0 : i32
    return %arg0, %c0_i32, %c0_i32_0 : i32, i32, i32
  }
  func.func @transform_3(%arg0: i32) -> (i32, i32, i32) {
    %c0_i32 = arith.constant 0 : i32
    %c0_i32_0 = arith.constant 0 : i32
    %c0_i32_1 = arith.constant 0 : i32
    return %arg0, %c0_i32, %c0_i32_0 : i32, i32, i32
  }
  func.func @transform_4(%arg0: i32) -> (i32, i32, i32) {
    %c0_i32 = arith.constant 0 : i32
    %c0_i32_0 = arith.constant 0 : i32
    %c0_i32_1 = arith.constant 0 : i32
    return %arg0, %c0_i32, %c0_i32_0 : i32, i32, i32
  }
}

</mosaic_0001>

<bundles_post_ra>
// kernel: tpu_custom_call.1
= control target key start
LH: loop header
LB: loop body
LE: loop exit
PB: predicated region body
PF: predicated region fallthrough
CT: control target
= control target key end

     0   :  { %9 = vsyncpa [#allocation3], 0  ;;  %s2916_s0 = inlined_call_operand.hbm [shape: f32[8,16,32], index: 0, kind: input, shape index: {}]   ;;  %s2917_s1 = inlined_call_operand.hbm [shape: f32[8,32,32], index: 1, kind: input, shape index: {}]   ;;  %s2918_s2 = inlined_call_operand.hbm [shape: f32[8,32,128], index: 2, kind: input, shape index: {}]   ;;  %s2919_s3 = inlined_call_operand.hbm [shape: u32[8,16,32], index: 3, kind: input, shape index: {}]   ;;  %s2920_s4 = inlined_call_operand.hbm [shape: f32[8,16,128], index: 4, kind: output, shape index: {}]  }
   0x1   :  { %10 = vsyncpa [#allocation6], 0 }
   0x2   :  { %11 = vsyncpa [#allocation9], 0 }
   0x3   :  { %12 = vsyncpa [#allocation4], 0  ;;  %s2522_s15 = smov [#allocation5]   ;;  %s2523_s17 = smov [#allocation2]  }
   0x4   :  { %s30_s16 = sshll.u32 %s2522_s15, 4  ;;  %s18_s18 = sshll.u32 %s2523_s17, 4  ;;  %s31_s16 = int_to_ptr.vmem [resolvable:$true] %s30_s16  ;;  %s2554_s18 = int_to_ptr.vmem [resolvable:$true] %s18_s18 }
   0x5   :  { %s2404_s21 = scalar_lea.hbm %s2917_s1, 4096 }
   0x6   :  { %p2405_p0 = scmp.ne.s32.totalorder %s2917_s1, %s2404_s21  ;;  %p2408_p1 = scmp.lt.u32.totalorder %s2404_s21, %s2917_s1 }
   0x8   :  { %p2410_p2 = pnand %p2408_p1, %p2405_p0 }
   0xa   :  { %2413 = shalt.err (!%p2410_p2)
}
   0xb   :  { %s2414_s26 = scalar_lea.vmem %s31_s16, 4096  ;;  %p2419_p4 = scmp.lt.s32.totalorder %s31_s16, %s31_s16 }
   0xc   :  { %p2415_p3 = scmp.ne.s32.totalorder %s31_s16, %s2414_s26  ;;  %p2420_p5 = scmp.lt.s32.totalorder %s2414_s26, %s2414_s26 }
   0xe   :  { %p2421_p6 = por %p2420_p5, %p2419_p4 }
  0x10   :  { %p2422_p7 = pnand %p2421_p6, %p2415_p3 }
  0x12   :  { %2425 = shalt.err (!%p2422_p7)
}
  0x13   :  { %s2524_s27 = smov 128   ;;  %s2525_s28 = smov 8  }
  0x14   :  { %36 = dma.hbm_to_vmem [thread:$0]  %s2917_s1, 4096, %s31_s16, [#allocation6], %s2524_s27, %s2524_s27, %s2525_s28  }
  0x15   :  { %s2426_s7 = scalar_lea.hbm %s2916_s0, 2048 }
  0x16   :  { %p2427_p8 = scmp.ne.s32.totalorder %s2916_s0, %s2426_s7  ;;  %p2430_p9 = scmp.lt.u32.totalorder %s2426_s7, %s2916_s0 }
  0x18   :  { %p2432_p10 = pnand %p2430_p9, %p2427_p8 }
  0x1a   :  { %2435 = shalt.err (!%p2432_p10)
}
  0x1b   :  { %s2436_s12 = scalar_lea.vmem %s2554_s18, 2048  ;;  %p2441_p12 = scmp.lt.s32.totalorder %s2554_s18, %s2554_s18 }
  0x1c   :  { %p2437_p11 = scmp.ne.s32.totalorder %s2554_s18, %s2436_s12  ;;  %p2442_p13 = scmp.lt.s32.totalorder %s2436_s12, %s2436_s12 }
  0x1e   :  { %p2443_p0 = por %p2442_p13, %p2441_p12 }
  0x20   :  { %p2444_p1 = pnand %p2443_p0, %p2437_p11 }
  0x22   :  { %2447 = shalt.err (!%p2444_p1)
}
  0x23   :  { %24 = dma.hbm_to_vmem [thread:$0]  %s2916_s0, 2048, %s2554_s18, [#allocation3], %s2524_s27, %s2524_s27, %s2525_s28  }
  0x24   :  { %s2526_s14 = smov [#allocation7]   ;;  %s2527_s16 = smov [#allocation8]  }
  0x25   :  { %s42_s15 = sshll.u32 %s2526_s14, 4  ;;  %s54_s17 = sshll.u32 %s2527_s16, 4  ;;  %s43_s15 = int_to_ptr.vmem [resolvable:$true] %s42_s15  ;;  %s2591_s17 = int_to_ptr.vmem [resolvable:$true] %s54_s17 }
  0x26   :  { %s2448_s21 = scalar_lea.hbm %s2918_s2, 4096 }
  0x27   :  { %p2449_p2 = scmp.ne.s32.totalorder %s2918_s2, %s2448_s21  ;;  %p2452_p3 = scmp.lt.u32.totalorder %s2448_s21, %s2918_s2 }
  0x29   :  { %p2454_p4 = pnand %p2452_p3, %p2449_p2 }
  0x2b   :  { %2457 = shalt.err (!%p2454_p4)
}
  0x2c   :  { %s2458_s0 = scalar_lea.vmem %s43_s15, 4096  ;;  %p2463_p6 = scmp.lt.s32.totalorder %s43_s15, %s43_s15 }
  0x2d   :  { %p2459_p5 = scmp.ne.s32.totalorder %s43_s15, %s2458_s0  ;;  %p2464_p7 = scmp.lt.s32.totalorder %s2458_s0, %s2458_s0 }
  0x2f   :  { %p2465_p8 = por %p2464_p7, %p2463_p6 }
  0x31   :  { %p2466_p9 = pnand %p2465_p8, %p2459_p5 }
  0x33   :  { %2469 = shalt.err (!%p2466_p9)
}
  0x34   :  { %48 = dma.hbm_to_vmem [thread:$0]  %s2918_s2, 4096, %s43_s15, [#allocation6], %s2524_s27, %s2524_s27, %s2525_s28  }
  0x35   :  { %s2470_s5 = scalar_lea.hbm %s2919_s3, 2048 }
  0x36   :  { %p2471_p10 = scmp.ne.s32.totalorder %s2919_s3, %s2470_s5  ;;  %p2474_p11 = scmp.lt.u32.totalorder %s2470_s5, %s2919_s3 }
  0x38   :  { %p2476_p12 = pnand %p2474_p11, %p2471_p10 }
  0x3a   :  { %2479 = shalt.err (!%p2476_p12)
}
  0x3b   :  { %s2480_s10 = scalar_lea.vmem %s2591_s17, 2048  ;;  %p2485_p0 = scmp.lt.s32.totalorder %s2591_s17, %s2591_s17 }
  0x3c   :  { %p2481_p13 = scmp.ne.s32.totalorder %s2591_s17, %s2480_s10  ;;  %p2486_p1 = scmp.lt.s32.totalorder %s2480_s10, %s2480_s10 }
  0x3e   :  { %p2487_p2 = por %p2486_p1, %p2485_p0 }
  0x40   :  { %p2488_p3 = pnand %p2487_p2, %p2481_p13 }
  0x42   :  { %2491 = shalt.err (!%p2488_p3)
}
  0x43   :  { %60 = dma.hbm_to_vmem [thread:$0]  %s2919_s3, 2048, %s2591_s17, [#allocation9], %s2524_s27, %s2524_s27, %s2525_s28  }
  0x44   :  { %2514 = dma.done.wait [#allocation3], 2048  }
  0x45   :  { %2515 = vsyncadd [#allocation3], 4294965248 }
  0x46   :  { %2516 = dma.done.wait [#allocation6], 8192  }
  0x47   :  { %2517 = vsyncadd [#allocation6], 4294959104 }
  0x48   :  { %2518 = dma.done.wait [#allocation9], 2048  }
  0x49   :  { %2519 = vsyncadd [#allocation9], 4294965248  ;;  %vm153_vm0 = vcmask 261120   ;;  %v89_v1 = vld [vmem:[#allocation5] sm:$0xff]  ;;  %v90_v2 = vld [vmem:[#allocation5 + $0x8] sm:$0xff]  ;;  %s2528_s3 = smov [#allocation10]  }
  0x4a   :  { %vm2630_vm1 = vmpackc.low %vm153_vm0, %vm153_vm0  ;;  %v93_v3 = vld [vmem:[#allocation5 + $0x20] sm:$0xff]  ;;  %v2173_v4 = vpack.c.bf16 %v90_v2, %v89_v1  ;;  %v94_v5 = vld [vmem:[#allocation5 + $0x28] sm:$0xff]  ;;  %s1823_s12 = sshll.u32 %s2528_s3, 4  ;;  %s1824_s12 = int_to_ptr.vmem [resolvable:$true] %s1823_s12 }
  0x4b   :  { %v91_v6 = vld [vmem:[#allocation5 + $0x10] sm:$0xff]  ;;  %v92_v7 = vld [vmem:[#allocation5 + $0x18] sm:$0xff]  ;;  %v2185_v8 = vpack.c.bf16 %v94_v5, %v93_v3  ;;  %v73_v12 = vld [vmem:[#allocation2] sm:$0xff]  ;;  %s2492_s1 = scalar_lea.vmem %s1824_s12, 2048  ;;  %p2497_p5 = scmp.lt.s32.totalorder %s1824_s12, %s1824_s12 }
  0x4c   :  { %v2179_v9 = vpack.c.bf16 %v92_v7, %v91_v6  ;;  %v95_v10 = vld [vmem:[#allocation5 + $0x30] sm:$0xff]  ;;  %v96_v11 = vld [vmem:[#allocation5 + $0x38] sm:$0xff]  ;;  %2175 = vmatprep.subr.msk.bf16.mxu0 %vm2630_vm1, %v2173_v4  ;;  %2005 = vmatprep.mubr.msk.f32.mxu0 %vm153_vm0, %v73_v12  ;;  %v97_v15 = vld [vmem:[#allocation5 + $0x40] sm:$0xff]  ;;  %p2493_p4 = scmp.ne.s32.totalorder %s1824_s12, %s2492_s1  ;;  %p2498_p6 = scmp.lt.s32.totalorder %s2492_s1, %s2492_s1 }
  0x4d   :  { %v2191_v13 = vpack.c.bf16 %v96_v11, %v95_v10  ;;  %v75_v14 = vld [vmem:[#allocation2 + $0x10] sm:$0xff]  ;;  %2187 = vmatprep.subr.msk.bf16.mxu1 %vm2630_vm1, %v2185_v8  ;;  %2178 = vmatpush3.bf16.xpose.msk.msra.mxu0 %vm2630_vm1, %v2173_v4  ;;  %v98_v16 = vld [vmem:[#allocation5 + $0x48] sm:$0xff]  ;;  %v101_v17 = vld [vmem:[#allocation5 + $0x60] sm:$0xff] }
  0x4e   :  { %2190 = vmatpush3.bf16.xpose.msk.msra.mxu1 %vm2630_vm1, %v2185_v8  ;;  %2181 = vmatprep.subr.msk.bf16.mxu0 %vm2630_vm1, %v2179_v9  ;;  %v102_v18 = vld [vmem:[#allocation5 + $0x68] sm:$0xff]  ;;  %v2197_v19 = vpack.c.bf16 %v98_v16, %v97_v15  ;;  %v99_v21 = vld [vmem:[#allocation5 + $0x50] sm:$0xff]  ;;  %v100_v22 = vld [vmem:[#allocation5 + $0x58] sm:$0xff]  ;;  %p2499_p7 = por %p2498_p6, %p2497_p5 }
  0x4f   :  { %2193 = vmatprep.subr.msk.bf16.mxu1 %vm2630_vm1, %v2191_v13  ;;  %2016 = vmatprep.mubr.msk.f32.mxu1 %vm153_vm0, %v75_v14  ;;  %v2209_v20 = vpack.c.bf16 %v102_v18, %v101_v17  ;;  %v103_v23 = vld [vmem:[#allocation5 + $0x70] sm:$0xff]  ;;  %v104_v24 = vld [vmem:[#allocation5 + $0x78] sm:$0xff]  ;;  %v74_v25 = vld [vmem:[#allocation2 + $0x8] sm:$0xff]  ;;  %v2203_v27 = vpack.c.bf16 %v100_v22, %v99_v21 }
  0x50   :  { %v76_v26 = vld [vmem:[#allocation2 + $0x18] sm:$0xff]  ;;  %v2215_v28 = vpack.c.bf16 %v104_v24, %v103_v23  ;;  %v77_v29 = vld [vmem:[#allocation2 + $0x20] sm:$0xff]  ;;  %v79_v30 = vld [vmem:[#allocation2 + $0x30] sm:$0xff]  ;;  %p2500_p8 = pnand %p2499_p7, %p2493_p4 }
  0x51   :  { %v105_v31 = vld [vmem:[#allocation5 + $0x80] sm:$0xff]  ;;  %v106_v32 = vld [vmem:[#allocation5 + $0x88] sm:$0xff]  ;;  %v107_v37 = vld [vmem:[#allocation5 + $0x90] sm:$0xff] }
  0x52   :  { %v109_v33 = vld [vmem:[#allocation5 + $0xa0] sm:$0xff]  ;;  %v110_v34 = vld [vmem:[#allocation5 + $0xa8] sm:$0xff]  ;;  %v2221_v35 = vpack.c.bf16 %v106_v32, %v105_v31  ;;  %v108_v38 = vld [vmem:[#allocation5 + $0x98] sm:$0xff] }
  0x53   :  { %v2233_v36 = vpack.c.bf16 %v110_v34, %v109_v33  ;;  %v111_v39 = vld [vmem:[#allocation5 + $0xb0] sm:$0xff]  ;;  %v112_v40 = vld [vmem:[#allocation5 + $0xb8] sm:$0xff]  ;;  %v78_v41 = vld [vmem:[#allocation2 + $0x28] sm:$0xff]  ;;  %v2227_v43 = vpack.c.bf16 %v108_v38, %v107_v37 }
  0x54   :  { %v80_v42 = vld [vmem:[#allocation2 + $0x38] sm:$0xff]  ;;  %v2239_v44 = vpack.c.bf16 %v112_v40, %v111_v39  ;;  %v81_v45 = vld [vmem:[#allocation2 + $0x40] sm:$0xff]  ;;  %v83_v46 = vld [vmem:[#allocation2 + $0x50] sm:$0xff] }
  0x55   :  { %2184 = vmatpush3.bf16.xpose.msk.msra.mxu0 %vm2630_vm1, %v2179_v9  ;;  %v113_v47 = vld [vmem:[#allocation5 + $0xc0] sm:$0xff]  ;;  %v114_v48 = vld [vmem:[#allocation5 + $0xc8] sm:$0xff]  ;;  %v115_v53 = vld [vmem:[#allocation5 + $0xd0] sm:$0xff] }
  0x56   :  { %2196 = vmatpush3.bf16.xpose.msk.msra.mxu1 %vm2630_vm1, %v2191_v13  ;;  %2199 = vmatprep.subr.msk.bf16.mxu0 %vm2630_vm1, %v2197_v19  ;;  %v117_v49 = vld [vmem:[#allocation5 + $0xe0] sm:$0xff]  ;;  %v118_v50 = vld [vmem:[#allocation5 + $0xe8] sm:$0xff]  ;;  %v2245_v51 = vpack.c.bf16 %v114_v48, %v113_v47  ;;  %v116_v54 = vld [vmem:[#allocation5 + $0xd8] sm:$0xff] }
  0x57   :  { %2211 = vmatprep.subr.msk.bf16.mxu1 %vm2630_vm1, %v2209_v20  ;;  %v2257_v52 = vpack.c.bf16 %v118_v50, %v117_v49  ;;  %v119_v55 = vld [vmem:[#allocation5 + $0xf0] sm:$0xff]  ;;  %v120_v56 = vld [vmem:[#allocation5 + $0xf8] sm:$0xff]  ;;  %v82_v57 = vld [vmem:[#allocation2 + $0x48] sm:$0xff]  ;;  %v2251_v59 = vpack.c.bf16 %v116_v54, %v115_v53 }
  0x58   :  { %v84_v58 = vld [vmem:[#allocation2 + $0x58] sm:$0xff]  ;;  %v2263_v60 = vpack.c.bf16 %v120_v56, %v119_v55  ;;  %v85_v61 = vld [vmem:[#allocation2 + $0x60] sm:$0xff]  ;;  %v87_v62 = vld [vmem:[#allocation2 + $0x70] sm:$0xff] }
  0x59   :  { %v86_v63 = vld [vmem:[#allocation2 + $0x68] sm:$0xff]  ;;  %v88_v1 = vld [vmem:[#allocation2 + $0x78] sm:$0xff] }
  0x5c   :  { %2006 = vmatmul.mubr.msk.f32.vlgmr.msra.gmra.mrb[0].mxu0 %vm153_vm0, %v74_v25 }
  0x5d   :  { %2017 = vmatmul.mubr.msk.f32.vlgmr.msra.gmra.mrb[0].mxu1 %vm153_vm0, %v76_v26  ;;  %2202 = vmatpush3.bf16.xpose.msk.msra.mxu0 %vm2630_vm1, %v2197_v19 }
  0x5e   :  { %2214 = vmatpush3.bf16.xpose.msk.msra.mxu1 %vm2630_vm1, %v2209_v20  ;;  %2205 = vmatprep.subr.msk.bf16.mxu0 %vm2630_vm1, %v2203_v27 }
  0x5f   :  { %2217 = vmatprep.subr.msk.bf16.mxu1 %vm2630_vm1, %v2215_v28  ;;  %2027 = vmatprep.mubr.msk.f32.mxu0 %vm153_vm0, %v77_v29 }
  0x60   :  { %2038 = vmatprep.mubr.msk.f32.mxu1 %vm153_vm0, %v79_v30 }
  0x65   :  { %2208 = vmatpush3.bf16.xpose.msk.msra.mxu0 %vm2630_vm1, %v2203_v27 }
  0x66   :  { %2220 = vmatpush3.bf16.xpose.msk.msra.mxu1 %vm2630_vm1, %v2215_v28  ;;  %2223 = vmatprep.subr.msk.bf16.mxu0 %vm2630_vm1, %v2221_v35 }
  0x67   :  { %2235 = vmatprep.subr.msk.bf16.mxu1 %vm2630_vm1, %v2233_v36 }
  0x6c   :  { %2028 = vmatmul.mubr.msk.f32.vlgmr.msra.gmra.mrb[2].mxu0 %vm153_vm0, %v78_v41 }
  0x6d   :  { %2039 = vmatmul.mubr.msk.f32.vlgmr.msra.gmra.mrb[2].mxu1 %vm153_vm0, %v80_v42  ;;  %2226 = vmatpush3.bf16.xpose.msk.msra.mxu0 %vm2630_vm1, %v2221_v35 }
  0x6e   :  { %2238 = vmatpush3.bf16.xpose.msk.msra.mxu1 %vm2630_vm1, %v2233_v36  ;;  %2229 = vmatprep.subr.msk.bf16.mxu0 %vm2630_vm1, %v2227_v43 }
  0x6f   :  { %2241 = vmatprep.subr.msk.bf16.mxu1 %vm2630_vm1, %v2239_v44  ;;  %2049 = vmatprep.mubr.msk.f32.mxu0 %vm153_vm0, %v81_v45 }
  0x70   :  { %2060 = vmatprep.mubr.msk.f32.mxu1 %vm153_vm0, %v83_v46 }
  0x75   :  { %2232 = vmatpush3.bf16.xpose.msk.msra.mxu0 %vm2630_vm1, %v2227_v43 }
  0x76   :  { %2244 = vmatpush3.bf16.xpose.msk.msra.mxu1 %vm2630_vm1, %v2239_v44  ;;  %2247 = vmatprep.subr.msk.bf16.mxu0 %vm2630_vm1, %v2245_v51 }
  0x77   :  { %2259 = vmatprep.subr.msk.bf16.mxu1 %vm2630_vm1, %v2257_v52 }
  0x7c   :  { %2050 = vmatmul.mubr.msk.f32.vlgmr.msra.gmra.mrb[4].mxu0 %vm153_vm0, %v82_v57 }
  0x7d   :  { %2061 = vmatmul.mubr.msk.f32.vlgmr.msra.gmra.mrb[4].mxu1 %vm153_vm0, %v84_v58  ;;  %2250 = vmatpush3.bf16.xpose.msk.msra.mxu0 %vm2630_vm1, %v2245_v51 }
  0x7e   :  { %2262 = vmatpush3.bf16.xpose.msk.msra.mxu1 %vm2630_vm1, %v2257_v52  ;;  %2253 = vmatprep.subr.msk.bf16.mxu0 %vm2630_vm1, %v2251_v59 }
  0x7f   :  { %2265 = vmatprep.subr.msk.bf16.mxu1 %vm2630_vm1, %v2263_v60  ;;  %2071 = vmatprep.mubr.msk.f32.mxu0 %vm153_vm0, %v85_v61 }
  0x80   :  { %2082 = vmatprep.mubr.msk.f32.mxu1 %vm153_vm0, %v87_v62 }
  0x85   :  { %2256 = vmatpush3.bf16.xpose.msk.msra.mxu0 %vm2630_vm1, %v2251_v59 }
  0x86   :  { %2268 = vmatpush3.bf16.xpose.msk.msra.mxu1 %vm2630_vm1, %v2263_v60 }
  0x8c   :  { %2072 = vmatmul.mubr.msk.f32.vlgmr.msra.gmra.mrb[6].mxu0 %vm153_vm0, %v86_v63 }
  0x8d   :  { %2083 = vmatmul.mubr.msk.f32.vlgmr.msra.gmra.mrb[6].mxu1 %vm153_vm0, %v88_v1 }
 0x12f   :  { %v2007_v2 = vpop.f32.mrb[0].mxu0 }
 0x130   :  { %v2714_v3 = vmul.f32 11.313708, %v2007_v2  ;;  %v2018_v4 = vpop.f32.mrb[0].mxu1  ;;  %v238_v5 = vpop.f32.mrb[1].mxu0 }
 0x131   :  { %v2716_v6 = vmul.f32 11.313708, %v238_v5  ;;  %v331_v7 = vpop.f32.mrb[1].mxu1  ;;  %v2718_v8 = vmul.f32 11.313708, %v2018_v4 }
 0x132   :  { %v917_v0 = vsel %vm153_vm0, %v2714_v3, -inf  ;;  %v2722_v9 = vmul.f32 11.313708, %v331_v7 }
 0x133   :  { %918 = vmax.xlane.f32.xlu1 %v917_v0  ;;  %v914_v10 = vsel %vm153_vm0, %v2716_v6, -inf  ;;  %v923_v11 = vsel %vm153_vm0, %v2718_v8, -inf }
 0x134   :  { %915 = vmax.xlane.f32.xlu0 %v914_v10  ;;  %v920_v12 = vsel %vm153_vm0, %v2722_v9, -inf }
 0x137   :  { %924 = vmax.xlane.f32.xlu1 %v923_v11 }
 0x138   :  { %921 = vmax.xlane.f32.xlu0 %v920_v12 }
 0x13f   :  { %v2029_v13 = vpop.f32.mrb[2].mxu0 }
 0x140   :  { %v2730_v14 = vmul.f32 11.313708, %v2029_v13  ;;  %v2040_v15 = vpop.f32.mrb[2].mxu1  ;;  %v424_v16 = vpop.f32.mrb[3].mxu0 }
 0x141   :  { %v2732_v17 = vmul.f32 11.313708, %v2040_v15  ;;  %v517_v18 = vpop.f32.mrb[3].mxu1  ;;  %v2734_v19 = vmul.f32 11.313708, %v424_v16 }
 0x142   :  { %v929_v20 = vsel %vm153_vm0, %v2730_v14, -inf  ;;  %v2738_v21 = vmul.f32 11.313708, %v517_v18 }
 0x143   :  { %v935_v22 = vsel %vm153_vm0, %v2732_v17, -inf  ;;  %930 = vmax.xlane.f32.xlu0 %v929_v20  ;;  %v926_v23 = vsel %vm153_vm0, %v2734_v19, -inf }
 0x144   :  { %936 = vmax.xlane.f32.xlu1 %v935_v22  ;;  %v932_v24 = vsel %vm153_vm0, %v2738_v21, -inf }
 0x147   :  { %927 = vmax.xlane.f32.xlu0 %v926_v23 }
 0x148   :  { %933 = vmax.xlane.f32.xlu1 %v932_v24 }
 0x14f   :  { %v2051_v25 = vpop.f32.mrb[4].mxu0 }
 0x150   :  { %v2746_v26 = vmul.f32 11.313708, %v2051_v25  ;;  %v2062_v27 = vpop.f32.mrb[4].mxu1  ;;  %v610_v28 = vpop.f32.mrb[5].mxu0 }
 0x151   :  { %v2748_v29 = vmul.f32 11.313708, %v2062_v27  ;;  %v703_v30 = vpop.f32.mrb[5].mxu1  ;;  %v2750_v31 = vmul.f32 11.313708, %v610_v28 }
 0x152   :  { %v941_v32 = vsel %vm153_vm0, %v2746_v26, -inf  ;;  %v2754_v33 = vmul.f32 11.313708, %v703_v30 }
 0x153   :  { %v947_v34 = vsel %vm153_vm0, %v2748_v29, -inf  ;;  %942 = vmax.xlane.f32.xlu0 %v941_v32  ;;  %v938_v35 = vsel %vm153_vm0, %v2750_v31, -inf }
 0x154   :  { %948 = vmax.xlane.f32.xlu1 %v947_v34  ;;  %v944_v36 = vsel %vm153_vm0, %v2754_v33, -inf }
 0x157   :  { %939 = vmax.xlane.f32.xlu0 %v938_v35 }
 0x158   :  { %945 = vmax.xlane.f32.xlu1 %v944_v36 }
 0x15f   :  { %v2073_v37 = vpop.f32.mrb[6].mxu0 }
 0x160   :  { %v2084_v38 = vpop.f32.mrb[6].mxu1  ;;  %v796_v39 = vpop.f32.mrb[7].mxu0  ;;  %v2766_v43 = vmul.f32 11.313708, %v2073_v37 }
 0x161   :  { %v2762_v40 = vmul.f32 11.313708, %v796_v39  ;;  %v889_v41 = vpop.f32.mrb[7].mxu1  ;;  %v2770_v45 = vmul.f32 11.313708, %v2084_v38  ;;  %v121_v39 = vld [vmem:[#allocation7] sm:$0xff] }
 0x162   :  { %v2764_v42 = vmul.f32 11.313708, %v889_v41  ;;  %v953_v47 = vsel %vm153_vm0, %v2766_v43, -inf  ;;  %v122_v41 = vld [vmem:[#allocation7 + $0x8] sm:$0xff] }
 0x163   :  { %v950_v44 = vsel %vm153_vm0, %v2762_v40, -inf  ;;  %v959_v48 = vsel %vm153_vm0, %v2770_v45, -inf }
 0x164   :  { %v956_v46 = vsel %vm153_vm0, %v2764_v42, -inf  ;;  %951 = vmax.xlane.f32.xlu0 %v950_v44  ;;  %v2269_v44 = vpack.c.bf16 %v122_v41, %v121_v39  ;;  %v1059_v39 = vld [vmem:[#allocation8 + $0x8] sm:$0xff] }
 0x165   :  { %957 = vmax.xlane.f32.xlu1 %v956_v46  ;;  %v123_v46 = vld [vmem:[#allocation7 + $0x10] sm:$0xff]  ;;  %vm1075_vm3 = vcmp.ge.u32.totalorder %v1059_v39, 3865470566 }
 0x166   :  { %2270 = vmatprep.subr.bf16.mxu0 %v2269_v44 }
 0x167   :  { %2272 = vmatpush3.bf16.msra.mxu0 %v2269_v44 }
 0x168   :  { %954 = vmax.xlane.f32.xlu0 %v953_v47  ;;  %v124_v47 = vld [vmem:[#allocation7 + $0x18] sm:$0xff] }
 0x169   :  { %960 = vmax.xlane.f32.xlu1 %v959_v48 }
 0x1c0   :  { %v919_v49 = vpop.xlane.xlu1 %918 }
 0x1c1   :  { %v963_v50 = vsub.f32 %v2714_v3, %v919_v49  ;;  %v916_v51 = vpop.xlane.xlu0 %915  ;;  %v2273_v49 = vpack.c.bf16 %v124_v47, %v123_v46  ;;  %v1060_v47 = vld [vmem:[#allocation8 + $0x10] sm:$0xff] }
 0x1c2   :  { %v962_v52 = vsub.f32 %v2716_v6, %v916_v51  ;;  %vm1076_vm4 = vcmp.ge.u32.totalorder %v1060_v47, 3865470566 }
 0x1c3   :  { %v980_v53 = vmul.f32 1.442695, %v963_v50  ;;  %v126_v50 = vld [vmem:[#allocation7 + $0x28] sm:$0xff]  ;;  %2274 = vmatprep.subr.bf16.mxu0 %v2273_v49 }
 0x1c4   :  { %v978_v54 = vmul.f32 1.442695, %v962_v52  ;;  %v925_v55 = vpop.xlane.xlu1 %924  ;;  %2276 = vmatpush3.bf16.msra.mxu0 %v2273_v49  ;;  %v131_v49 = vld [vmem:[#allocation7 + $0x50] sm:$0xff] }
 0x1c5   :  { %2340 = vpow2.f32 %v980_v53  ;;  %v965_v56 = vsub.f32 %v2718_v8, %v925_v55  ;;  %v922_v57 = vpop.xlane.xlu0 %921 }
 0x1c6   :  { %v964_v58 = vsub.f32 %v2722_v9, %v922_v57  ;;  %2342 = vpow2.f32 %v978_v54  ;;  %v127_v57 = vld [vmem:[#allocation7 + $0x30] sm:$0xff] }
 0x1c7   :  { %v984_v59 = vmul.f32 1.442695, %v965_v56 }
 0x1c8   :  { %v982_v60 = vmul.f32 1.442695, %v964_v58  ;;  %v128_v58 = vld [vmem:[#allocation7 + $0x38] sm:$0xff] }
 0x1c9   :  { %2344 = vpow2.f32 %v984_v59 }
 0x1ca   :  { %2346 = vpow2.f32 %v982_v60 }
 0x1cf   :  { %v2782_v61 = vpop.eup %2340 }
 0x1d0   :  { %v931_v62 = vpop.xlane.xlu0 %930  ;;  %v1013_v63 = vsel %vm153_vm0, %v2782_v61, 0.0  ;;  %v2786_v1 = vpop.eup %2342 }
 0x1d1   :  { %v937_v2 = vpop.xlane.xlu1 %936  ;;  %v967_v3 = vsub.f32 %v2730_v14, %v931_v62  ;;  %1014 = vadd.xlane.f32.xlu0 %v1013_v63  ;;  %v1010_v9 = vsel %vm153_vm0, %v2786_v1, 0.0  ;;  %v2281_v62 = vpack.c.bf16 %v128_v58, %v127_v57 }
 0x1d2   :  { %v969_v4 = vsub.f32 %v2732_v17, %v937_v2 }
 0x1d3   :  { %v2790_v5 = vpop.eup %2344  ;;  %v988_v6 = vmul.f32 1.442695, %v967_v3 }
 0x1d4   :  { %v992_v7 = vmul.f32 1.442695, %v969_v4  ;;  %v928_v8 = vpop.xlane.xlu0 %927  ;;  %v1019_v0 = vsel %vm153_vm0, %v2790_v5, 0.0  ;;  %v2796_v10 = vpop.eup %2346 }
 0x1d5   :  { %2348 = vpow2.f32 %v988_v6  ;;  %v934_v11 = vpop.xlane.xlu1 %933  ;;  %v966_v12 = vsub.f32 %v2734_v19, %v928_v8  ;;  %1020 = vadd.xlane.f32.xlu1 %v1019_v0  ;;  %1011 = vadd.xlane.f32.xlu0 %v1010_v9  ;;  %v1016_v16 = vsel %vm153_vm0, %v2796_v10, 0.0 }
 0x1d6   :  { %2350 = vpow2.f32 %v992_v7  ;;  %v968_v13 = vsub.f32 %v2738_v21, %v934_v11  ;;  %v129_v11 = vld [vmem:[#allocation7 + $0x40] sm:$0xff] }
 0x1d7   :  { %v986_v14 = vmul.f32 1.442695, %v966_v12  ;;  %v130_v12 = vld [vmem:[#allocation7 + $0x48] sm:$0xff] }
 0x1d8   :  { %v990_v15 = vmul.f32 1.442695, %v968_v13  ;;  %v133_v13 = vld [vmem:[#allocation7 + $0x60] sm:$0xff] }
 0x1d9   :  { %2352 = vpow2.f32 %v986_v14  ;;  %1017 = vadd.xlane.f32.xlu1 %v1016_v16  ;;  %v2842_v14 = vpack.c.bf16 %v130_v12, %v129_v11  ;;  %v1063_v12 = vld [vmem:[#allocation8 + $0x28] sm:$0xff] }
 0x1da   :  { %2354 = vpow2.f32 %v990_v15  ;;  %v134_v15 = vld [vmem:[#allocation7 + $0x68] sm:$0xff]  ;;  %vm1079_vm6 = vcmp.ge.u32.totalorder %v1063_v12, 3865470566 }
 0x1db   :  { %v2844_v16 = vpack.c.bf16 %v134_v15, %v133_v13  ;;  %2286 = vmatprep.subr.bf16.mxu0 %v2842_v14 }
 0x1df   :  { %v2802_v17 = vpop.eup %2348 }
 0x1e0   :  { %v2804_v18 = vpop.eup %2350  ;;  %v943_v20 = vpop.xlane.xlu0 %942  ;;  %v1025_v19 = vsel %vm153_vm0, %v2802_v17, 0.0 }
 0x1e1   :  { %v949_v22 = vpop.xlane.xlu1 %948  ;;  %v971_v23 = vsub.f32 %v2746_v26, %v943_v20  ;;  %v1031_v21 = vsel %vm153_vm0, %v2804_v18, 0.0  ;;  %1026 = vadd.xlane.f32.xlu0 %v1025_v19 }
 0x1e2   :  { %v973_v24 = vsub.f32 %v2748_v29, %v949_v22  ;;  %1032 = vadd.xlane.f32.xlu1 %v1031_v21 }
 0x1e3   :  { %v2812_v25 = vpop.eup %2352  ;;  %v996_v27 = vmul.f32 1.442695, %v971_v23 }
 0x1e4   :  { %v2814_v28 = vpop.eup %2354  ;;  %v1000_v30 = vmul.f32 1.442695, %v973_v24  ;;  %v940_v32 = vpop.xlane.xlu0 %939  ;;  %v1022_v34 = vsel %vm153_vm0, %v2812_v25, 0.0 }
 0x1e5   :  { %2356 = vpow2.f32 %v996_v27  ;;  %v946_v35 = vpop.xlane.xlu1 %945  ;;  %v970_v26 = vsub.f32 %v2750_v31, %v940_v32  ;;  %v1028_v36 = vsel %vm153_vm0, %v2814_v28, 0.0  ;;  %1023 = vadd.xlane.f32.xlu0 %v1022_v34  ;;  %v125_v31 = vld [vmem:[#allocation7 + $0x20] sm:$0xff] }
 0x1e6   :  { %2358 = vpow2.f32 %v1000_v30  ;;  %v972_v29 = vsub.f32 %v2754_v33, %v946_v35  ;;  %1029 = vadd.xlane.f32.xlu1 %v1028_v36  ;;  %v2277_v52 = vpack.c.bf16 %v126_v50, %v125_v31  ;;  %v132_v50 = vld [vmem:[#allocation7 + $0x58] sm:$0xff] }
 0x1e7   :  { %v994_v37 = vmul.f32 1.442695, %v970_v26 }
 0x1e8   :  { %v998_v38 = vmul.f32 1.442695, %v972_v29  ;;  %2278 = vmatprep.subr.bf16.mxu1 %v2277_v52  ;;  %v1058_v29 = vld [vmem:[#allocation8] sm:$0xff] }
 0x1e9   :  { %2360 = vpow2.f32 %v994_v37  ;;  %2280 = vmatpush3.bf16.msra.mxu1 %v2277_v52  ;;  %vm1074_vm2 = vcmp.ge.u32.totalorder %v1058_v29, 3865470566  ;;  %v143_v29 = vld [vmem:[#allocation7 + $0xb0] sm:$0xff] }
 0x1ea   :  { %2362 = vpow2.f32 %v998_v38  ;;  %2282 = vmatprep.subr.bf16.mxu1 %v2281_v62 }
 0x1ed   :  { %2284 = vmatpush3.bf16.msra.mxu1 %v2281_v62  ;;  %v135_v62 = vld [vmem:[#allocation7 + $0x70] sm:$0xff] }
 0x1ee   :  { %2294 = vmatprep.subr.bf16.mxu1 %v2844_v16 }
 0x1ef   :  { %v2822_v48 = vpop.eup %2356 }
 0x1f0   :  { %v2824_v51 = vpop.eup %2358  ;;  %v1037_v33 = vsel %vm153_vm0, %v2822_v48, 0.0 }
 0x1f1   :  { %v1043_v53 = vsel %vm153_vm0, %v2824_v51, 0.0  ;;  %1038 = vadd.xlane.f32.xlu0 %v1037_v33  ;;  %v952_v54 = vpop.xlane.xlu0 %951 }
 0x1f2   :  { %v958_v55 = vpop.xlane.xlu1 %957  ;;  %1044 = vadd.xlane.f32.xlu1 %v1043_v53  ;;  %v974_v56 = vsub.f32 %v2762_v40, %v952_v54  ;;  %v1061_v53 = vld [vmem:[#allocation8 + $0x18] sm:$0xff] }
 0x1f3   :  { %v2831_v59 = vpop.eup %2360  ;;  %v976_v60 = vsub.f32 %v2764_v42, %v958_v55  ;;  %vm1077_vm5 = vcmp.ge.u32.totalorder %v1061_v53, 3865470566 }
 0x1f4   :  { %v2834_v63 = vpop.eup %2362  ;;  %v1002_v2 = vmul.f32 1.442695, %v974_v56  ;;  %v1034_v3 = vsel %vm153_vm0, %v2831_v59, 0.0 }
 0x1f5   :  { %v1006_v4 = vmul.f32 1.442695, %v976_v60  ;;  %v1040_v40 = vsel %vm153_vm0, %v2834_v63, 0.0  ;;  %1035 = vadd.xlane.f32.xlu0 %v1034_v3  ;;  %v955_v6 = vpop.xlane.xlu0 %954  ;;  %v2289_v60 = vpack.c.bf16 %v132_v50, %v131_v49  ;;  %v149_v49 = vld [vmem:[#allocation7 + $0xe0] sm:$0xff]  ;;  %v150_v50 = vld [vmem:[#allocation7 + $0xe8] sm:$0xff] }
 0x1f6   :  { %2364 = vpow2.f32 %v1002_v2  ;;  %v961_v7 = vpop.xlane.xlu1 %960  ;;  %1041 = vadd.xlane.f32.xlu1 %v1040_v40  ;;  %v975_v42 = vsub.f32 %v2766_v43, %v955_v6 }
 0x1f7   :  { %2366 = vpow2.f32 %v1006_v4  ;;  %v977_v8 = vsub.f32 %v2770_v45, %v961_v7  ;;  %v138_v4 = vld [vmem:[#allocation7 + $0x88] sm:$0xff] }
 0x1f8   :  { %v1004_v0 = vmul.f32 1.442695, %v975_v42  ;;  %v142_v42 = vld [vmem:[#allocation7 + $0xa8] sm:$0xff] }
 0x1f9   :  { %v1008_v9 = vmul.f32 1.442695, %v977_v8 }
 0x1fa   :  { %2368 = vpow2.f32 %v1004_v0 }
 0x1fb   :  { %2370 = vpow2.f32 %v1008_v9 }
 0x200   :  { %v2848_v43 = vpop.eup %2364 }
 0x201   :  { %v2850_v45 = vpop.eup %2366  ;;  %v1046_v20 = vsel %vm153_vm0, %v2848_v43, 0.0 }
 0x202   :  { %v1052_v19 = vsel %vm153_vm0, %v2850_v45, 0.0  ;;  %1047 = vadd.xlane.f32.xlu0 %v1046_v20  ;;  %v1064_v20 = vld [vmem:[#allocation8 + $0x30] sm:$0xff] }
 0x203   :  { %1053 = vadd.xlane.f32.xlu1 %v1052_v19  ;;  %vm1080_vm8 = vcmp.ge.u32.totalorder %v1064_v20, 3865470566 }
 0x204   :  { %v2856_v22 = vpop.eup %2368 }
 0x205   :  { %v2858_v23 = vpop.eup %2370  ;;  %v1049_v21 = vsel %vm153_vm0, %v2856_v22, 0.0 }
 0x206   :  { %v1055_v24 = vsel %vm153_vm0, %v2858_v23, 0.0  ;;  %1050 = vadd.xlane.f32.xlu0 %v1049_v21 }
 0x207   :  { %1056 = vadd.xlane.f32.xlu1 %v1055_v24 }
 0x25e   :  { %v1015_v27 = vpop.xlane.xlu0 %1014 }
 0x25f   :  { %2372 = vrcp.f32 %v1015_v27  ;;  %v1065_v27 = vld [vmem:[#allocation8 + $0x38] sm:$0xff] }
 0x260   :  { %vm1081_vm9 = vcmp.ge.u32.totalorder %v1065_v27, 3865470566 }
 0x262   :  { %v1021_v30 = vpop.xlane.xlu1 %1020  ;;  %v1012_v32 = vpop.xlane.xlu0 %1011 }
 0x263   :  { %2374 = vrcp.f32 %v1021_v30 }
 0x264   :  { %2376 = vrcp.f32 %v1012_v32 }
 0x266   :  { %v1018_v34 = vpop.xlane.xlu1 %1017 }
 0x267   :  { %2378 = vrcp.f32 %v1018_v34  ;;  %v139_v34 = vld [vmem:[#allocation7 + $0x90] sm:$0xff] }
 0x269   :  { %v2373_v35 = vpop.eup %2372 }
 0x26a   :  { %v1093_v26 = vmul.f32 10.0, %v2373_v35  ;;  %v140_v35 = vld [vmem:[#allocation7 + $0x98] sm:$0xff] }
 0x26c   :  { %v1123_v31 = vmul.f32 %v2782_v61, %v1093_v26  ;;  %v136_v61 = vld [vmem:[#allocation7 + $0x78] sm:$0xff] }
 0x26d   :  { %v2375_v36 = vpop.eup %2374 }
 0x26e   :  { %v2377_v37 = vpop.eup %2376  ;;  %v1027_v38 = vpop.xlane.xlu0 %1026  ;;  %v1097_v41 = vmul.f32 10.0, %v2375_v36  ;;  %v1139_v3 = vsel %vm1075_vm3, %v1123_v31, 0.0  ;;  %v145_v31 = vld [vmem:[#allocation7 + $0xc0] sm:$0xff] }
 0x26f   :  { %v1091_v44 = vmul.f32 10.0, %v2377_v37  ;;  %v1033_v46 = vpop.xlane.xlu1 %1032  ;;  %2380 = vrcp.f32 %v1027_v38  ;;  %v144_v37 = vld [vmem:[#allocation7 + $0xb8] sm:$0xff] }
 0x270   :  { %2382 = vrcp.f32 %v1033_v46  ;;  %v1125_v56 = vmul.f32 %v2790_v5, %v1097_v41  ;;  %v2297_v5 = vpack.c.bf16 %v136_v61, %v135_v62  ;;  %v1068_v62 = vld [vmem:[#allocation8 + $0x50] sm:$0xff] }
 0x271   :  { %v2379_v33 = vpop.eup %2378  ;;  %v1122_v52 = vmul.f32 %v2786_v1, %v1091_v44  ;;  %v137_v1 = vld [vmem:[#allocation7 + $0x80] sm:$0xff]  ;;  %vm1084_vm12 = vcmp.ge.u32.totalorder %v1068_v62, 3865470566 }
 0x272   :  { %v1095_v54 = vmul.f32 10.0, %v2379_v33  ;;  %v1024_v55 = vpop.xlane.xlu0 %1023  ;;  %v1141_v6 = vsel %vm1077_vm5, %v1125_v56, 0.0  ;;  %v2301_v7 = vpack.c.bf16 %v138_v4, %v137_v1  ;;  %v1067_v56 = vld [vmem:[#allocation8 + $0x48] sm:$0xff] }
 0x273   :  { %v1030_v57 = vpop.xlane.xlu1 %1029  ;;  %2384 = vrcp.f32 %v1024_v55  ;;  %v1138_v58 = vsel %vm1074_vm2, %v1122_v52, 0.0  ;;  %v2325_v52 = vpack.c.bf16 %v150_v50, %v149_v49  ;;  %vm1083_vm10 = vcmp.ge.u32.totalorder %v1067_v56, 3865470566 }
 0x274   :  { %v1124_v2 = vmul.f32 %v2796_v10, %v1095_v54  ;;  %2386 = vrcp.f32 %v1030_v57  ;;  %2093 = vmatprep.mubr.msk.f32.mxu0 %vm153_vm0, %v1138_v58  ;;  %v141_v10 = vld [vmem:[#allocation7 + $0xa0] sm:$0xff] }
 0x275   :  { %2094 = vmatmul.mubr.msk.f32.vlgmr.msra.gmra.mrb[8].mxu0 %vm153_vm0, %v1139_v3  ;;  %v2309_v9 = vpack.c.bf16 %v142_v42, %v141_v10  ;;  %v1066_v58 = vld [vmem:[#allocation8 + $0x40] sm:$0xff]  ;;  %v1069_v3 = vld [vmem:[#allocation8 + $0x58] sm:$0xff] }
 0x276   :  { %v1140_v40 = vsel %vm1076_vm4, %v1124_v2, 0.0  ;;  %2288 = vmatpush3.bf16.msra.mxu0 %v2842_v14  ;;  %v1062_v14 = vld [vmem:[#allocation8 + $0x20] sm:$0xff]  ;;  %vm1082_vm11 = vcmp.ge.u32.totalorder %v1066_v58, 3865470566  ;;  %vm1085_vm13 = vcmp.ge.u32.totalorder %v1069_v3, 3865470566 }
 0x277   :  { %2104 = vmatprep.mubr.msk.f32.mxu1 %vm153_vm0, %v1140_v40  ;;  %2290 = vmatprep.subr.bf16.mxu0 %v2289_v60  ;;  %vm1078_vm7 = vcmp.ge.u32.totalorder %v1062_v14, 3865470566 }
 0x278   :  { %2105 = vmatmul.mubr.msk.f32.vlgmr.msra.gmra.mrb[8].mxu1 %vm153_vm0, %v1141_v6  ;;  %v148_v6 = vld [vmem:[#allocation7 + $0xd8] sm:$0xff] }
 0x279   :  { %v2381_v8 = vpop.eup %2380  ;;  %2296 = vmatpush3.bf16.msra.mxu1 %v2844_v16 }
 0x27a   :  { %v2383_v0 = vpop.eup %2382  ;;  %2298 = vmatprep.subr.bf16.mxu1 %v2297_v5  ;;  %2292 = vmatpush3.bf16.msra.mxu0 %v2289_v60  ;;  %v1101_v11 = vmul.f32 10.0, %v2381_v8  ;;  %v151_v8 = vld [vmem:[#allocation7 + $0xf0] sm:$0xff] }
 0x27b   :  { %2302 = vmatprep.subr.bf16.mxu0 %v2301_v7  ;;  %v1105_v13 = vmul.f32 10.0, %v2383_v0  ;;  %v152_v0 = vld [vmem:[#allocation7 + $0xf8] sm:$0xff] }
 0x27c   :  { %v1127_v16 = vmul.f32 %v2802_v17, %v1101_v11  ;;  %v2305_v17 = vpack.c.bf16 %v140_v35, %v139_v34  ;;  %v1073_v35 = vld [vmem:[#allocation8 + $0x78] sm:$0xff] }
 0x27d   :  { %v2385_v15 = vpop.eup %2384  ;;  %2300 = vmatpush3.bf16.msra.mxu1 %v2297_v5  ;;  %v1129_v26 = vmul.f32 %v2804_v18, %v1105_v13  ;;  %v2313_v18 = vpack.c.bf16 %v144_v37, %v143_v29  ;;  %v147_v5 = vld [vmem:[#allocation7 + $0xd0] sm:$0xff]  ;;  %vm1089_vm2 = vcmp.ge.u32.totalorder %v1073_v35, 3865470566 }
 0x27e   :  { %v2387_v19 = vpop.eup %2386  ;;  %v1099_v21 = vmul.f32 10.0, %v2385_v15  ;;  %v1039_v24 = vpop.xlane.xlu0 %1038  ;;  %2310 = vmatprep.subr.bf16.mxu1 %v2309_v9  ;;  %v1143_v47 = vsel %vm1079_vm6, %v1127_v16, 0.0 }
 0x27f   :  { %v1103_v30 = vmul.f32 10.0, %v2387_v19  ;;  %v1045_v32 = vpop.xlane.xlu1 %1044  ;;  %2388 = vrcp.f32 %v1039_v24  ;;  %v1072_v19 = vld [vmem:[#allocation8 + $0x70] sm:$0xff] }
 0x280   :  { %v1126_v36 = vmul.f32 %v2812_v25, %v1099_v21  ;;  %2390 = vrcp.f32 %v1045_v32  ;;  %v146_v25 = vld [vmem:[#allocation7 + $0xc8] sm:$0xff]  ;;  %vm1088_vm15 = vcmp.ge.u32.totalorder %v1072_v19, 3865470566 }
 0x281   :  { %v1128_v38 = vmul.f32 %v2814_v28, %v1103_v30  ;;  %v1145_v28 = vsel %vm1081_vm9, %v1129_v26, 0.0  ;;  %v2317_v33 = vpack.c.bf16 %v146_v25, %v145_v31  ;;  %v1071_v30 = vld [vmem:[#allocation8 + $0x68] sm:$0xff] }
 0x282   :  { %v1036_v39 = vpop.xlane.xlu0 %1035  ;;  %v1142_v41 = vsel %vm1078_vm7, %v1126_v36, 0.0  ;;  %vm1087_vm1 = vcmp.ge.u32.totalorder %v1071_v30, 3865470566 }
 0x283   :  { %v1042_v44 = vpop.xlane.xlu1 %1041  ;;  %2392 = vrcp.f32 %v1036_v39  ;;  %2115 = vmatprep.mubr.msk.f32.mxu0 %vm153_vm0, %v1142_v41  ;;  %v1144_v46 = vsel %vm1080_vm8, %v1128_v38, 0.0 }
 0x284   :  { %2394 = vrcp.f32 %v1042_v44  ;;  %2126 = vmatprep.mubr.msk.f32.mxu1 %vm153_vm0, %v1144_v46  ;;  %2116 = vmatmul.mubr.msk.f32.vlgmr.msra.gmra.mrb[10].mxu0 %vm153_vm0, %v1143_v47 }
 0x285   :  { %2127 = vmatmul.mubr.msk.f32.vlgmr.msra.gmra.mrb[10].mxu1 %vm153_vm0, %v1145_v28  ;;  %2304 = vmatpush3.bf16.msra.mxu0 %v2301_v7 }
 0x286   :  { %2312 = vmatpush3.bf16.msra.mxu1 %v2309_v9  ;;  %2306 = vmatprep.subr.bf16.mxu0 %v2305_v17 }
 0x287   :  { %2314 = vmatprep.subr.bf16.mxu1 %v2313_v18 }
 0x289   :  { %v2389_v53 = vpop.eup %2388  ;;  %2308 = vmatpush3.bf16.msra.mxu0 %v2305_v17 }
 0x28a   :  { %v2391_v54 = vpop.eup %2390  ;;  %2316 = vmatpush3.bf16.msra.mxu1 %v2313_v18  ;;  %2318 = vmatprep.subr.bf16.mxu0 %v2317_v33  ;;  %v1109_v55 = vmul.f32 10.0, %v2389_v53 }
 0x28b   :  { %2326 = vmatprep.subr.bf16.mxu1 %v2325_v52  ;;  %v1113_v57 = vmul.f32 10.0, %v2391_v54 }
 0x28c   :  { %v1131_v1 = vmul.f32 %v2822_v48, %v1109_v55  ;;  %v2321_v48 = vpack.c.bf16 %v148_v6, %v147_v5 }
 0x28d   :  { %v2393_v60 = vpop.eup %2392  ;;  %v1133_v7 = vmul.f32 %v2824_v51, %v1113_v57  ;;  %v2329_v51 = vpack.c.bf16 %v152_v0, %v151_v8 }
 0x28e   :  { %v2395_v61 = vpop.eup %2394  ;;  %v1107_v2 = vmul.f32 10.0, %v2393_v60  ;;  %v1147_v14 = vsel %vm1083_vm10, %v1131_v1, 0.0 }
 0x28f   :  { %v1111_v4 = vmul.f32 10.0, %v2395_v61  ;;  %v1048_v40 = vpop.xlane.xlu0 %1047  ;;  %v1149_v15 = vsel %vm1085_vm13, %v1133_v7, 0.0 }
 0x290   :  { %v1130_v10 = vmul.f32 %v2831_v59, %v1107_v2  ;;  %v1054_v42 = vpop.xlane.xlu1 %1053  ;;  %2396 = vrcp.f32 %v1048_v40 }
 0x291   :  { %v1132_v9 = vmul.f32 %v2834_v63, %v1111_v4  ;;  %2398 = vrcp.f32 %v1054_v42  ;;  %v1070_v63 = vld [vmem:[#allocation8 + $0x60] sm:$0xff] }
 0x292   :  { %v1146_v11 = vsel %vm1082_vm11, %v1130_v10, 0.0  ;;  %vm1086_vm14 = vcmp.ge.u32.totalorder %v1070_v63, 3865470566 }
 0x293   :  { %v1148_v12 = vsel %vm1084_vm12, %v1132_v9, 0.0  ;;  %2137 = vmatprep.mubr.msk.f32.mxu0 %vm153_vm0, %v1146_v11  ;;  %v1051_v13 = vpop.xlane.xlu0 %1050 }
 0x294   :  { %2148 = vmatprep.mubr.msk.f32.mxu1 %vm153_vm0, %v1148_v12  ;;  %v1057_v59 = vpop.xlane.xlu1 %1056  ;;  %2400 = vrcp.f32 %v1051_v13  ;;  %2138 = vmatmul.mubr.msk.f32.vlgmr.msra.gmra.mrb[12].mxu0 %vm153_vm0, %v1147_v14 }
 0x295   :  { %2402 = vrcp.f32 %v1057_v59  ;;  %2149 = vmatmul.mubr.msk.f32.vlgmr.msra.gmra.mrb[12].mxu1 %vm153_vm0, %v1149_v15  ;;  %2320 = vmatpush3.bf16.msra.mxu0 %v2317_v33 }
 0x296   :  { %2328 = vmatpush3.bf16.msra.mxu1 %v2325_v52  ;;  %2322 = vmatprep.subr.bf16.mxu0 %v2321_v48 }
 0x297   :  { %2330 = vmatprep.subr.bf16.mxu1 %v2329_v51 }
 0x299   :  { %2324 = vmatpush3.bf16.msra.mxu0 %v2321_v48 }
 0x29a   :  { %v2397_v20 = vpop.eup %2396  ;;  %2332 = vmatpush3.bf16.msra.mxu1 %v2329_v51 }
 0x29b   :  { %v2399_v21 = vpop.eup %2398  ;;  %v1115_v24 = vmul.f32 10.0, %v2397_v20 }
 0x29c   :  { %v1119_v27 = vmul.f32 10.0, %v2399_v21 }
 0x29d   :  { %v1134_v16 = vmul.f32 %v2848_v43, %v1115_v24 }
 0x29e   :  { %v2401_v32 = vpop.eup %2400  ;;  %v1136_v34 = vmul.f32 %v2850_v45, %v1119_v27 }
 0x29f   :  { %v2403_v26 = vpop.eup %2402  ;;  %v1117_v36 = vmul.f32 10.0, %v2401_v32  ;;  %v1150_v29 = vsel %vm1086_vm14, %v1134_v16, 0.0 }
 0x2a0   :  { %v1121_v37 = vmul.f32 10.0, %v2403_v26  ;;  %2159 = vmatprep.mubr.msk.f32.mxu0 %vm153_vm0, %v1150_v29  ;;  %v1152_v38 = vsel %vm1088_vm15, %v1136_v34, 0.0 }
 0x2a1   :  { %v1135_v39 = vmul.f32 %v2856_v22, %v1117_v36  ;;  %2170 = vmatprep.mubr.msk.f32.mxu1 %vm153_vm0, %v1152_v38 }
 0x2a2   :  { %v1137_v43 = vmul.f32 %v2858_v23, %v1121_v37 }
 0x2a3   :  { %v1151_v41 = vsel %vm1087_vm1, %v1135_v39, 0.0 }
 0x2a4   :  { %2160 = vmatmul.mubr.msk.f32.vlgmr.msra.gmra.mrb[14].mxu0 %vm153_vm0, %v1151_v41  ;;  %v1153_v45 = vsel %vm1089_vm2, %v1137_v43, 0.0 }
 0x2a5   :  { %2171 = vmatmul.mubr.msk.f32.vlgmr.msra.gmra.mrb[14].mxu1 %vm153_vm0, %v1153_v45 }
 0x348   :  { %v2095_v17 = vpop.f32.mrb[8].mxu0 }
 0x349   :  { %1803 = vst [vmem:[#allocation10 + $0x8] sm:$0xff] %v2095_v17  ;;  %v1226_v44 = vpop.f32.mrb[9].mxu0 }
 0x34a   :  { %1802 = vst [vmem:[#allocation10] sm:$0xff] %v1226_v44 }
 0x34b   :  { %v2106_v46 = vpop.f32.mrb[8].mxu1 }
 0x34c   :  { %1805 = vst [vmem:[#allocation10 + $0x18] sm:$0xff] %v2106_v46  ;;  %v1307_v47 = vpop.f32.mrb[9].mxu1 }
 0x34d   :  { %1804 = vst [vmem:[#allocation10 + $0x10] sm:$0xff] %v1307_v47 }
 0x357   :  { %v2117_v22 = vpop.f32.mrb[10].mxu0 }
 0x358   :  { %1807 = vst [vmem:[#allocation10 + $0x28] sm:$0xff] %v2117_v22  ;;  %v2128_v18 = vpop.f32.mrb[10].mxu1  ;;  %v1388_v31 = vpop.f32.mrb[11].mxu0 }
 0x359   :  { %1809 = vst [vmem:[#allocation10 + $0x38] sm:$0xff] %v2128_v18  ;;  %1806 = vst [vmem:[#allocation10 + $0x20] sm:$0xff] %v1388_v31  ;;  %v1469_v23 = vpop.f32.mrb[11].mxu1 }
 0x35a   :  { %1808 = vst [vmem:[#allocation10 + $0x30] sm:$0xff] %v1469_v23 }
 0x367   :  { %v2139_v25 = vpop.f32.mrb[12].mxu0 }
 0x368   :  { %1811 = vst [vmem:[#allocation10 + $0x48] sm:$0xff] %v2139_v25  ;;  %v2150_v28 = vpop.f32.mrb[12].mxu1  ;;  %v1550_v49 = vpop.f32.mrb[13].mxu0 }
 0x369   :  { %1813 = vst [vmem:[#allocation10 + $0x58] sm:$0xff] %v2150_v28  ;;  %1810 = vst [vmem:[#allocation10 + $0x40] sm:$0xff] %v1550_v49  ;;  %v1631_v50 = vpop.f32.mrb[13].mxu1 }
 0x36a   :  { %1812 = vst [vmem:[#allocation10 + $0x50] sm:$0xff] %v1631_v50 }
 0x377   :  { %v2161_v33 = vpop.f32.mrb[14].mxu0 }
 0x378   :  { %1815 = vst [vmem:[#allocation10 + $0x68] sm:$0xff] %v2161_v33  ;;  %v2172_v52 = vpop.f32.mrb[14].mxu1  ;;  %v1712_v53 = vpop.f32.mrb[15].mxu0 }
 0x379   :  { %1817 = vst [vmem:[#allocation10 + $0x78] sm:$0xff] %v2172_v52  ;;  %1814 = vst [vmem:[#allocation10 + $0x60] sm:$0xff] %v1712_v53  ;;  %v1793_v54 = vpop.f32.mrb[15].mxu1 }
 0x37a   :  { %1816 = vst [vmem:[#allocation10 + $0x70] sm:$0xff] %v1793_v54 }
 0x37b   :  { %2503 = shalt.err (!%p2500_p8)
}
 0x37c   :  { %s2504_s15 = scalar_lea.hbm %s2920_s4, 2048 }
 0x37d   :  { %p2505_p9 = scmp.ne.s32.totalorder %s2920_s4, %s2504_s15  ;;  %p2508_p10 = scmp.lt.u32.totalorder %s2504_s15, %s2920_s4 }
 0x37f   :  { %p2510_p11 = pnand %p2508_p10, %p2505_p9 }
 0x381   :  { %2513 = shalt.err (!%p2510_p11)
}
 0x382   :  { %1829 = dma.vmem_to_hbm [thread:$0]  %s1824_s12, 2048, %s2920_s4, [#allocation4], %s2524_s27, %s2524_s27, %s2525_s28  }
 0x383   :  { %2520 = dma.done.wait [#allocation4], 2048  }
 0x384   :  { %2521 = vsyncadd [#allocation4], 4294965248 }
 0x385   :  { %1833 = vsyncpa [#allocation3], 1 }
 0x386   :  { %1834 = vsyncpa [#allocation6], 1 }
 0x387   :  { %1835 = vsyncpa [#allocation9], 1 }
 0x388   :  { %1836 = vsyncpa [#allocation4], 1 }

</bundles_post_ra>
